<compile_context>
chip_gen: v6e
topology: v6e:2x2x1
jax: 0.10.0
libtpu: 0.0.40
codegen_flags: <defaults>
</compile_context>

<pallas_src>
import functools

import jax
import jax.numpy as jnp
from jax.experimental import pallas as pl
from jax.experimental.pallas import tpu as pltpu

EPS = 1e-6
LANES = 128
# 8192 x 128 f32 = 4 MiB per input per pipeline buffer; 2 inputs x 2 buffers = 16 MiB.
MAX_BLOCK_ROWS = 8192
VMEM_LIMIT_BYTES = 32 * 1024 * 1024  # lift v5e's 16 MiB scoped default; no-op on v6e/v7x


def _round_up(x, m):
    return ((x + m - 1) // m) * m


def _cdiv(a, b):
    return (a + b - 1) // b


def _fold(err, block_rows):
    # (block_rows, 128) -> (8, 128): reshape matches the native (8, 128) f32
    # tiling (no data movement); the axis-0 sum is pure VPU vreg adds.
    return err.reshape(block_rows // 8, 8, LANES).sum(axis=0)


def _charbonnier_kernel(x_ref, y_ref, o_ref, *, block_rows, rows_in_last, needs_mask):
    # x_ref, y_ref: (block_rows, LANES) in the inputs' original dtype.
    # o_ref: (1, 8, LANES) f32 per-block partial sums.
    diff = x_ref[...].astype(jnp.float32) - y_ref[...].astype(jnp.float32)
    err = jnp.sqrt(diff * diff + jnp.float32(EPS))

    if not needs_mask:
        o_ref[0] = _fold(err, block_rows)
        return

    is_last = pl.program_id(0) == pl.num_programs(0) - 1

    @pl.when(jnp.logical_not(is_last))
    def _():
        # Steady state: no mask work at all.
        o_ref[0] = _fold(err, block_rows)

    @pl.when(is_last)
    def _():
        # Row-granularity mask: zero out the overhanging (garbage) rows of the
        # final partial block. Lane padding inside the last valid row is NOT
        # masked here; its exact contribution is subtracted in the wrapper.
        row_id = jax.lax.broadcasted_iota(jnp.int32, (block_rows, LANES), 0)
        masked = jnp.where(row_id < rows_in_last, err, jnp.float32(0.0))
        o_ref[0] = _fold(masked, block_rows)


def charbonnier_loss(x, y):
    assert x.shape == y.shape, "X and Y must have the same shape"
    n = int(x.size)

    xf = x.reshape(-1)
    yf = y.reshape(-1)

    # Pad the flat length to a multiple of the lane width only when needed
    # (rare). Padded elements are zero in both inputs -> each contributes
    # exactly sqrt(EPS), which we subtract from the final sum.
    pad = (LANES - n % LANES) % LANES
    if pad:
        xf = jnp.pad(xf, (0, pad))
        yf = jnp.pad(yf, (0, pad))

    rows = (n + pad) // LANES
    x2 = xf.reshape(rows, LANES)
    y2 = yf.reshape(rows, LANES)

    # Sublane multiple depends on dtype packing (8 for 4B, 16 for 2B, 32 for 1B).
    itemsize = min(jnp.dtype(x.dtype).itemsize, jnp.dtype(y.dtype).itemsize)
    sublane_mult = max(8, 8 * (4 // max(1, itemsize)))

    # Large blocks to amortize per-step overhead, but capped at ~rows/2 so the
    # "parallel" grid axis has >= 2 steps to shard across v7x's two TensorCores.
    block_rows = min(MAX_BLOCK_ROWS, _round_up(_cdiv(rows, 2), sublane_mult))
    block_rows = max(block_rows, sublane_mult)

    num_blocks = _cdiv(rows, block_rows)
    rows_in_last = rows - (num_blocks - 1) * block_rows
    needs_mask = rows_in_last != block_rows  # only the final block can be ragged

    kernel = functools.partial(
        _charbonnier_kernel,
        block_rows=block_rows,
        rows_in_last=rows_in_last,
        needs_mask=needs_mask,
    )

    partials = pl.pallas_call(
        kernel,
        out_shape=jax.ShapeDtypeStruct((num_blocks, 8, LANES), jnp.float32),
        grid_spec=pl.GridSpec(
            grid=(num_blocks,),
            in_specs=[
                pl.BlockSpec((block_rows, LANES), lambda i: (i, 0)),
                pl.BlockSpec((block_rows, LANES), lambda i: (i, 0)),
            ],
            out_specs=pl.BlockSpec((1, 8, LANES), lambda i: (i, 0, 0)),
        ),
        compiler_params=pltpu.CompilerParams(
            # Independent per-block partials -> parallel (uses both TCs on v7x).
            dimension_semantics=("parallel",),
            vmem_limit_bytes=VMEM_LIMIT_BYTES,
        ),
    )(x2, y2)

    # Final (tiny) reduction over the lane-parallel partial sums, minus the
    # known contribution of the zero lane-padding.
    total = jnp.sum(partials)
    if pad:
        total = total - jnp.float32(pad) * jnp.sqrt(jnp.float32(EPS))
    return total


if __name__ == "__main__":
    key = jax.random.PRNGKey(0)
    kx, ky = jax.random.split(key)
    # NCHW, small shapes: batch=2, channels=4, spatial=16x16
    X = jax.random.normal(kx, (2, 4, 16, 16), dtype=jnp.float32)
    Y = jax.random.normal(ky, (2, 4, 16, 16), dtype=jnp.float32)

    loss = charbonnier_loss(X, Y)
    jax.block_until_ready(loss)

    # Reference check in plain JAX
    ref = jnp.sum(jnp.sqrt((X - Y) * (X - Y) + EPS))
    assert jnp.allclose(loss, ref, rtol=1e-5, atol=1e-5), (loss, ref)

    print("KERNEL_OK")
</pallas_src>

<mosaic_0001>
module attributes {stable_mosaic.version = 11 : i64} {
  func.func @_charbonnier_kernel(%arg0: i32, %arg1: memref<8x128xf32, #tpu.memory_space<vmem>>, %arg2: memref<8x128xf32, #tpu.memory_space<vmem>>, %arg3: memref<1x8x128xf32, #tpu.memory_space<vmem>>) attributes {dimension_semantics = [#tpu.dimension_semantics<parallel>], iteration_bounds = array<i64: 2>, scalar_prefetch = 0 : i64, scratch_operands = 0 : i64, tpu.core_type = #tpu.core_type<tc>, window_params = [{transform_indices = @transform_0, window_bounds = array<i64: 8, 128>}, {transform_indices = @transform_1, window_bounds = array<i64: 8, 128>}, {transform_indices = @transform_2, window_bounds = array<i64: 1, 8, 128>}]} {
    %c0 = arith.constant 0 : index
    %c0_0 = arith.constant 0 : index
    %0 = vector.load %arg1[%c0, %c0_0] : memref<8x128xf32, #tpu.memory_space<vmem>>, vector<8x128xf32>
    %c0_1 = arith.constant 0 : index
    %c0_2 = arith.constant 0 : index
    %1 = vector.load %arg2[%c0_1, %c0_2] : memref<8x128xf32, #tpu.memory_space<vmem>>, vector<8x128xf32>
    %2 = arith.subf %0, %1 : vector<8x128xf32>
    %3 = arith.mulf %2, %2 : vector<8x128xf32>
    %cst = arith.constant 9.99999997E-7 : f32
    %4 = vector.broadcast %cst : f32 to vector<8x128xf32>
    %5 = arith.addf %3, %4 : vector<8x128xf32>
    %6 = math.sqrt %5 : vector<8x128xf32>
    %7 = vector.shape_cast %6 : vector<8x128xf32> to vector<1x8x128xf32>
    %cst_3 = arith.constant dense<0.000000e+00> : vector<8x128xf32>
    %8 = vector.multi_reduction <add>, %7, %cst_3 [0] : vector<1x8x128xf32> to vector<8x128xf32>
    %c0_4 = arith.constant 0 : index
    %c0_5 = arith.constant 0 : index
    %c0_6 = arith.constant 0 : index
    %9 = vector.load %arg3[%c0_4, %c0_5, %c0_6] : memref<1x8x128xf32, #tpu.memory_space<vmem>>, vector<1x8x128xf32>
    %10 = vector.shape_cast %9 : vector<1x8x128xf32> to vector<8x128xf32>
    %11 = vector.shape_cast %8 : vector<8x128xf32> to vector<1x8x128xf32>
    tpu.vector_store %arg3[%c0_4, %c0_5, %c0_6], %11 {strides = array<i32>} : memref<1x8x128xf32, #tpu.memory_space<vmem>>, vector<1x8x128xf32>,
    return
  }
  func.func @transform_0(%arg0: i32) -> (i32, i32) {
    %c0_i32 = arith.constant 0 : i32
    %c0_i32_0 = arith.constant 0 : i32
    return %arg0, %c0_i32 : i32, i32
  }
  func.func @transform_1(%arg0: i32) -> (i32, i32) {
    %c0_i32 = arith.constant 0 : i32
    %c0_i32_0 = arith.constant 0 : i32
    return %arg0, %c0_i32 : i32, i32
  }
  func.func @transform_2(%arg0: i32) -> (i32, i32, i32) {
    %c0_i32 = arith.constant 0 : i32
    %c0_i32_0 = arith.constant 0 : i32
    %c0_i32_1 = arith.constant 0 : i32
    return %arg0, %c0_i32, %c0_i32_0 : i32, i32, i32
  }
}

</mosaic_0001>

<bundles_post_ra>
// kernel: tpu_custom_call.1
= control target key start
LH: loop header
LB: loop body
LE: loop exit
PB: predicated region body
PF: predicated region fallthrough
CT: control target
= control target key end

     0   :  { %7 = vsyncpa [#allocation3], 0  ;;  %s729_s0 = inlined_call_operand.hbm [shape: f32[16,128], index: 0, kind: input, shape index: {}]   ;;  %s730_s1 = inlined_call_operand.hbm [shape: f32[16,128], index: 1, kind: input, shape index: {}]   ;;  %s731_s2 = inlined_call_operand.hbm [shape: f32[2,8,128], index: 2, kind: output, shape index: {}]  }
   0x1   :  { %9 = vsyncpa [#allocation3 + $0x1], 0 }
   0x2   :  { %10 = vsyncpa [#allocation6], 0 }
   0x3   :  { %12 = vsyncpa [#allocation6 + $0x1], 0 }
   0x4   :  { %13 = vsyncpa [#allocation4], 0 }
   0x5   :  { %15 = vsyncpa [#allocation4 + $0x1], 0  ;;  %s529_s9 = smov 0   ;;  %s531_s10 = smov 0  }
   0x6   :  { %s533_s11 = smov 0   ;;  %s535_s12 = smov 0  }
   0x7 LB: > { %s550_s13 = sadd.s32 4294967295, %s509_s12   ;;  %s317_s14 = sadd.s32 4294967294, %s509_s12   ;;  %s509_s12 = sphi %s535_s12, %s750_s12   ;;  %s505_s11 = sphi %s533_s11, %s749_s11   ;;  %s501_s10 = sphi %s531_s10, %s748_s10   ;;  %s497_s9 = sphi %s529_s9, %s747_s9  }
   0x8   : > { %s554_s15 = sadd.s32 1, %s509_s12   ;;  %s28_s16 = sadd.s32 1, %s505_s11 }
   0x9   : > { %s25_s17 = ssub.s32 %s509_s12, %s554_s15  ;;  %p35_p0 = scmp.ne.s32.totalorder %s505_s11, %s501_s10 }
   0xa   : > { %p26_p1 = scmp.eq.s32.totalorder %s25_s17, 0  ;;  %p36_p2 = scmp.eq.s32.totalorder %s509_s12, 0 }
   0xb   : > { %p41_p3 = scmp.ne.s32.totalorder %s501_s10, %s497_s9  ;;  %p42_p4 = scmp.eq.s32.totalorder %s550_s13, 0 }
   0xc   : > { %s566_s18 = scalar_select %p26_p1, %s505_s11, %s28_s16  }
   0xd   : > { %p568_p5 = por %p36_p2, %p35_p0  ;;  %p572_p6 = por %p42_p4, %p41_p3 }
   0xe   : > { %p91_p7 = scmp.eq.s32.totalorder %s550_s13, 1  ;;  %p97_p8 = scmp.eq.s32.totalorder %s317_s14, 1 }
   0xf   : > { %s735_s20 = scalar_select %p572_p6, 1, 0 }
  0x10   : > { %p349_p10 = scmp.lt.s32.totalorder %s509_s12, 2  ;;  %p579_p11 = por %p91_p7, %p35_p0 }
  0x11   : > { %p583_p12 = por %p97_p8, %p41_p3  ;;  %s588_s23 = sand.u32 1, %s505_s11  }
  0x12   : > { %s736_s21 = scalar_select %p579_p11, 1, 0 }
  0x13   : > { %s737_s22 = scalar_select %p583_p12, 1, 0 }
  0x14   : > { %s321_s24 = sshll.u32 %s509_s12, 7  ;;  %s320_s25 = sshll.u32 %s588_s23, 3 }
  0x15   : > { %s597_s28 = scalar_lea.hbm %s729_s0, %s321_s24  ;;  %s121_s29 = scalar_lea.vmem [#allocation2], %s320_s25 }
  0x16   : > { %s128_s30 = sshll.u32 %s121_s29, 4  ;;  %p603_p13 = pnand %p349_p10, %p568_p5  ;;  %s607_s30 = int_to_ptr.vmem [resolvable:$true] %s128_s30 }
  0x17   : > { %s118_s4 = scalar_lea.sflag [#allocation3], %s588_s23  ;;  %s385_s5 = scalar_lea.hbm %s597_s28, 128 }
  0x18   : > { %p386_p2 = scmp.ne.s32.totalorder %s597_s28, %s385_s5  ;;  %p387_p3 = pneg %p603_p13 }
  0x19   : > { %s390_s8 = scalar_lea.hbm %s729_s0, 256  ;;  %p391_p5 = scmp.lt.s32.totalorder %s597_s28, %s729_s0 }
  0x1a   : > { %p388_p4 = pnand %p387_p3, %p386_p2  ;;  %p392_p8 = scmp.lt.s32.totalorder %s390_s8, %s385_s5 }
  0x1c   : > { %p389_p7 = pneg %p388_p4  ;;  %p393_p10 = por %p392_p8, %p391_p5 }
  0x1e   : > { %p394_p9 = pnand %p393_p10, %p389_p7 }
  0x20   : > { %397 = shalt.err (!%p394_p9)
}
  0x21   : > { %s398_s17 = scalar_lea.vmem %s607_s30, 128  ;;  %s511_s19 = smov [#allocation2]  }
  0x22   : > { %p399_p0 = scmp.ne.s32.totalorder %s607_s30, %s398_s17  ;;  %s403_s26 = sshll.u32 %s511_s19, 4  ;;  %s404_s26 = int_to_ptr.vmem [resolvable:$false] %s403_s26 }
  0x23   : > { %s405_s27 = scalar_lea.vmem %s404_s26, 256  ;;  %p406_p1 = scmp.lt.s32.totalorder %s607_s30, %s404_s26 }
  0x24   : > { %p401_p2 = pnand %p399_p0, %p387_p3  ;;  %p407_p12 = scmp.lt.s32.totalorder %s405_s27, %s398_s17 }
  0x26   : > { %p402_p4 = pneg %p401_p2  ;;  %p408_p11 = por %p407_p12, %p406_p1 }
  0x28   : > { %p409_p5 = pnand %p408_p11, %p402_p4 }
  0x2a   : > { %412 = shalt.err (!%p409_p5)
}
  0x2b   : > { %341 = dma.hbm_to_vmem [thread:$0]  (!%p603_p13), %s597_s28, 128, %s607_s30, %s118_s4  }
  0x2c   : > { %p739_p9 = scmp.lt.s32.totalorder %s509_s12, 3  ;;  %p740_p0 = scmp.ge.s32.totalorder %s509_s12, 1 }
  0x2d   : > { %s649_s7 = scalar_lea.hbm %s730_s1, %s321_s24  ;;  %s139_s8 = scalar_lea.vmem [#allocation5], %s320_s25 }
  0x2e   : > { %p640_p7 = pnand %p740_p0, %p739_p9  ;;  %s146_s14 = sshll.u32 %s139_s8, 4  ;;  %s147_s14 = int_to_ptr.vmem [resolvable:$true] %s146_s14 }
  0x2f   : > { %s136_s28 = scalar_lea.sflag [#allocation6], %s588_s23  ;;  %s413_s30 = scalar_lea.hbm %s649_s7, 128 }
  0x30   : > { %s741_s29 = scalar_select %p640_p7, 1, 0 }
  0x31   : > { %p414_p11 = scmp.ne.s32.totalorder %s649_s7, %s413_s30  ;;  %s418_s17 = scalar_lea.hbm %s730_s1, 256 }
  0x32   : > { %p419_p8 = scmp.lt.s32.totalorder %s649_s7, %s730_s1  ;;  %p420_p10 = scmp.lt.s32.totalorder %s418_s17, %s413_s30 }
  0x33   : > { %p416_p12 = pnand %p414_p11, %p387_p3 }
  0x34   : > { %p421_p2 = por %p420_p10, %p419_p8 }
  0x35   : > { %p417_p1 = pneg %p416_p12 }
  0x37   : > { %p422_p4 = pnand %p421_p2, %p417_p1 }
  0x39   : > { %425 = shalt.err (!%p422_p4)
}
  0x3a   : > { %s426_s25 = scalar_lea.vmem %s147_s14, 128  ;;  %s512_s23 = smov [#allocation5]  }
  0x3b   : > { %p427_p5 = scmp.ne.s32.totalorder %s147_s14, %s426_s25  ;;  %s431_s26 = sshll.u32 %s512_s23, 4  ;;  %s432_s26 = int_to_ptr.vmem [resolvable:$false] %s431_s26 }
  0x3c   : > { %s433_s27 = scalar_lea.vmem %s432_s26, 256  ;;  %p434_p11 = scmp.lt.s32.totalorder %s147_s14, %s432_s26 }
  0x3d   : > { %p429_p9 = pnand %p427_p5, %p387_p3  ;;  %p435_p12 = scmp.lt.s32.totalorder %s433_s27, %s426_s25 }
  0x3f   : > { %p430_p0 = pneg %p429_p9  ;;  %p436_p6 = por %p435_p12, %p434_p11 }
  0x41   : > { %p437_p7 = pnand %p436_p6, %p430_p0 }
  0x43   : > { %440 = shalt.err (!%p437_p7)
}
  0x44   : > { %344 = dma.hbm_to_vmem [thread:$0]  (!%p603_p13), %s649_s7, 128, %s147_s14, %s136_s28  }
  0x45   : > { %p742_p1 = scmp.ne.s32.totalorder %s741_s29, 0 }
  0x46   : > { %s675_s5 = sand.u32 (!%p742_p1), 1, %s501_s10   ;;  %p743_p3 = scmp.ne.s32.totalorder (!%p742_p1), %s735_s20, 0 }
  0x47   : > { %155 = sbr.rel (%p742_p1) target bundleno = 117 (0x75), region = 28  ;;  %s325_s6 = sshll.u32 (!%p742_p1), %s675_s5, 3 }
  0x48   : > { %s158_s8 = scalar_lea.sflag (!%p742_p1), [#allocation3], %s675_s5  ;;  %s161_s30 = scalar_lea.vmem (!%p742_p1), [#allocation2], %s325_s6 }
  0x4c   : > { %484 = dma.done.wait (%p743_p3), %s158_s8, 128  }
  0x4d   : > { %486 = vsyncadd (%p743_p3), %s158_s8, 4294967168  ;;  %s167_s3 = scalar_lea.sflag [#allocation6], %s675_s5  ;;  %s170_s7 = scalar_lea.vmem [#allocation5], %s325_s6 }
  0x4e   : > { %488 = dma.done.wait (%p743_p3), %s167_s3, 128  }
  0x4f   : > { %490 = vsyncadd (%p743_p3), %s167_s3, 4294967168  ;;  %v196_v0 = vld [vmem:[%s161_s30] sm:$0xff]  ;;  %v197_v1 = vld [vmem:[%s170_s7] sm:$0xff]  ;;  %s195_s29 = scalar_lea.vmem [#allocation7], %s325_s6  ;;  %s329_s28 = sshll.u32 %s550_s13, 7 }
  0x50   : > { %v198_v2 = vsub.f32 %v196_v0, %v197_v1  ;;  %s224_s14 = sshll.u32 %s195_s29, 4  ;;  %s222_s16 = scalar_lea.hbm %s731_s2, %s329_s28  ;;  %s689_s14 = int_to_ptr.vmem [resolvable:$true] %s224_s14 }
  0x51   : > { %s211_s17 = scalar_lea.sflag [#allocation4], %s675_s5  ;;  %s441_s24 = scalar_lea.vmem %s689_s14, 128 }
  0x52   : > { %v199_v3 = vmul.f32 %v198_v2, %v198_v2  ;;  %p442_p6 = scmp.ne.s32.totalorder %s689_s14, %s441_s24  ;;  %p744_p13 = scmp.ne.s32.totalorder %s736_s21, 0 }
  0x53   : > { %s513_s13 = smov [#allocation7]  }
  0x54   : > { %v200_v4 = vadd.f32 1e-06, %v199_v3  ;;  %p443_p7 = pnand %p442_p6, %p744_p13  ;;  %s445_s19 = sshll.u32 %s513_s13, 4  ;;  %s446_s19 = int_to_ptr.vmem [resolvable:$false] %s445_s19 }
  0x55   : > { %s447_s25 = scalar_lea.vmem %s446_s19, 256  ;;  %p448_p10 = scmp.lt.s32.totalorder %s689_s14, %s446_s19 }
  0x56   : > { %383 = vrsqrt.f32 %v200_v4  ;;  %vm203_vm0 = vcmp.eq.f32.partialorder %v200_v4, inf  ;;  %v206_v6 = vand.u32 2147483648, %v200_v4  ;;  %vm205_vm1 = vcmp.eq.f32.partialorder %v200_v4, 0.0  ;;  %p444_p8 = pneg %p443_p7  ;;  %p449_p2 = scmp.lt.s32.totalorder %s447_s25, %s441_s24 }
  0x58   : > { %p450_p4 = por %p449_p2, %p448_p10 }
  0x5a   : > { %p451_p5 = pnand %p450_p4, %p444_p8 }
  0x63   : > { %v384_v5 = vpop.eup %383 }
  0x64   : > { %v202_v7 = vmul.f32 %v384_v5, %v200_v4 }
  0x66   : > { %v204_v8 = vsel %vm203_vm0, %v200_v4, %v202_v7 }
  0x67   : > { %v207_v9 = vsel %vm205_vm1, %v206_v6, %v204_v8 }
  0x68   : > { %209 = vst [vmem:[%s195_s29] sm:$0xff] %v207_v9 }
  0x69   : > { %454 = shalt.err (!%p451_p5)
}
  0x6a   : > { %s455_s23 = scalar_lea.hbm %s222_s16, 128  ;;  %s459_s5 = scalar_lea.hbm %s731_s2, 256 }
  0x6b   : > { %p456_p9 = scmp.ne.s32.totalorder %s222_s16, %s455_s23  ;;  %p460_p12 = scmp.lt.s32.totalorder %s222_s16, %s731_s2 }
  0x6c   : > { %p461_p1 = scmp.lt.s32.totalorder %s459_s5, %s455_s23 }
  0x6d   : > { %p457_p0 = pnand %p456_p9, %p744_p13 }
  0x6e   : > { %p462_p3 = por %p461_p1, %p460_p12 }
  0x6f   : > { %p458_p11 = pneg %p457_p0 }
  0x71   : > { %p463_p6 = pnand %p462_p3, %p458_p11 }
  0x73   : > { %466 = shalt.err (!%p463_p6)
}
  0x74   : > { %336 = dma.vmem_to_hbm [thread:$0]  (%p744_p13), %s689_s14, 128, %s222_s16, %s211_s17  }
  0x75 PF: > { %s236_s30 = sand.u32 1, %s497_s9   ;;  %p745_p7 = scmp.ne.s32.totalorder %s737_s22, 0 }
  0x76   : > { %p746_p8 = scmp.ge.s32.totalorder %s509_s12, 2  ;;  %s237_s3 = scalar_lea.sflag [#allocation4], %s236_s30 }
  0x78   : > { %p346_p10 = pnand %p746_p8, %p745_p7 }
  0x7a   : > { %p347_p2 = pneg %p346_p10 }
  0x7c   : > { %492 = dma.done.wait (%p347_p2), %s237_s3, 128  }
  0x7d   : > { %494 = vsyncadd (%p347_p2), %s237_s3, 4294967168  ;;  %p18_p4 = scmp.ge.s32.totalorder %s554_s15, 4   ;;  %s747_s9 = smov %s501_s10 }
  0x7e   : > { %s748_s10 = smov %s505_s11  ;;  %s749_s11 = smov %s566_s18 }
  0x7f   : > { %s750_s12 = smov %s554_s15  ;;  %20 = sbr.rel (!%p18_p4) target bundleno = 7 (0x7), region = 86 }
  0x84   :  { %242 = vsyncpa [#allocation3], 1 }
  0x85   :  { %244 = vsyncpa [#allocation3 + $0x1], 1 }
  0x86   :  { %245 = vsyncpa [#allocation6], 1 }
  0x87   :  { %247 = vsyncpa [#allocation6 + $0x1], 1 }
  0x88   :  { %248 = vsyncpa [#allocation4], 1 }
  0x89   :  { %250 = vsyncpa [#allocation4 + $0x1], 1 }

</bundles_post_ra>
